<compile_context>
chip_gen: v6e
topology: v6e:2x2x1
jax: 0.10.0
libtpu: 0.0.40
codegen_flags: <defaults>
</compile_context>

<pallas_src>
import functools

import jax
import jax.numpy as jnp
from jax import lax
from jax.experimental import pallas as pl
from jax.experimental.pallas import tpu as pltpu


def _histogram_loss_kernel(feat_ref, masks_ref, out_ref, *,
                           n_pad, tsize, t_pad, step, eps):
    # feat_ref : (n_pad, D)          f32  (batch padded to a multiple of 8)
    # masks_ref: (8, n_pad*n_pad)    f32  row0 = pos-pair mask, row1 = neg-pair
    #                                     mask (strict upper triangle, real rows
    #                                     only), rows 2..7 = 0.
    # out_ref  : (1, 1)              f32  scalar loss
    f32 = jnp.float32
    bp = n_pad
    p = bp * bp
    inv_step = 1.0 / step

    f = feat_ref[...]                                              # (bp, D)

    # --- L2Normalization: x / ||x||_2 along dim=1 (rsqrt -> EUP slot).
    # The tiny epsilon also keeps zero / padded rows finite (they are masked out).
    inv_norm = lax.rsqrt(jnp.sum(f * f, axis=1, keepdims=True) + 1e-12)
    fn = f * inv_norm                                              # (bp, D)

    # --- cosine similarity matrix on the MXU: dists[i, j] = fn[i] . fn[j]
    dists = lax.dot_general(fn, fn, (((1,), (1,)), ((), ())),
                            preferred_element_type=f32)            # (bp, bp)
    # TODO(synk): torch's host-side runtime assert (dists within [-1-eps, 1+eps])
    # has no in-kernel equivalent and is omitted.

    # --- linearize the pair grid onto sublanes: s[p] = dists[i, j], p = i*bp + j.
    # broadcast over a new leading dim + leading-dim merge keeps the lane dim
    # intact (no lane<->sublane relayout); the column selection uses iota
    # compares only (no vector integer division). dists is symmetric, so
    # picking dists[p % bp, p // bp] equals dists[p // bp, p % bp].
    d_tiled = jnp.broadcast_to(dists[None, :, :],
                               (bp, bp, bp)).reshape(p, bp)        # row p -> dists[p % bp, :]
    p_idx = lax.broadcasted_iota(jnp.int32, (p, bp), 0)
    c_idx = lax.broadcasted_iota(jnp.int32, (p, bp), 1)
    sel = (p_idx >= c_idx * bp) & (p_idx < (c_idx + 1) * bp)       # sel[p, c] == (c == p // bp)
    s = jnp.sum(jnp.where(sel, d_tiled, 0.0),
                axis=1, keepdims=True)                             # (p, 1)

    # --- soft (linearly interpolated) histogram contributions, T on lanes.
    s_floor = jnp.floor(s / step) * step                           # (p, 1), matches torch fp
    ki = lax.broadcasted_iota(jnp.int32, (1, t_pad), 1)            # bin index k
    kf = ki.astype(f32)
    t_lane = kf * step - 1.0                                       # bin centers t[k] in [-1, 1]
    lane_a = ki < tsize                                            # valid bins for indsa
    lane_b = ki < (tsize - 1)                                      # indsb[k] = indsa[k+1]; none for last bin

    diff = s_floor - (t_lane - step)                               # (p, t_pad)
    indsa = (diff > -eps) & (diff < eps) & lane_a
    # indsb[k] == indsa[k+1]  <=>  |s_floor - t[k]| < eps : reuse `diff` with
    # thresholds shifted by `step` instead of a second subtract chain / roll.
    indsb = (diff > step - eps) & (diff < step + eps) & lane_b

    val_a = (s - t_lane + step) * inv_step                         # (p, t_pad)
    # torch assigns val_a first, then val_b (val_b wins on overlap), so indsb is
    # the outer select.  val_b = (-s + t + step)/step == 2 - val_a.
    contrib = jnp.where(indsb, 2.0 - val_a, jnp.where(indsa, val_a, 0.0))

    # --- both histograms in a single MXU matmul.
    masks = masks_ref[...]                                         # (8, p)
    hist = jnp.dot(masks, contrib, preferred_element_type=f32)     # (8, t_pad); row0=pos, row1=neg

    pos_size = jnp.sum(masks[0:1, :], axis=1, keepdims=True)       # (1, 1)
    neg_size = jnp.sum(masks[1:2, :], axis=1, keepdims=True)
    inv_pos = 1.0 / jnp.maximum(pos_size, 1.0)                     # guard empty pos/neg pair sets
    inv_neg = 1.0 / jnp.maximum(neg_size, 1.0)

    # --- loss = sum_{i <= j} hist_pos[i] * hist_neg[j]
    #          = sum_i hist_pos[i] * (sum_{j >= i} hist_neg[j])
    # bins >= tsize carry exactly zero, so no extra masking is needed.
    jj = lax.broadcasted_iota(jnp.int32, (t_pad, t_pad), 0)
    ii = lax.broadcasted_iota(jnp.int32, (t_pad, t_pad), 1)
    mask_ge = jnp.where(jj >= ii, 1.0, 0.0)                        # mask_ge[j, i] = (j >= i)
    revcdf = jnp.dot(hist, mask_ge, preferred_element_type=f32)    # revcdf[r, i] = sum_{j>=i} hist[r, j]
    loss = (jnp.sum(hist[0:1, :] * revcdf[1:2, :], keepdims=True)
            * inv_pos * inv_neg)                                   # (1, 1)
    out_ref[...] = loss


def histogram_loss(features, classes, *, num_steps=150 + 1):
    """Pallas TPU implementation of HistogramLoss.forward (torchreid)."""
    features = jnp.squeeze(jnp.asarray(features, jnp.float32))  # mimic L2Normalization's squeeze
    classes = jnp.asarray(classes, jnp.int32)
    b, d = features.shape

    n_pad = max(8, ((b + 7) // 8) * 8)        # pad batch to a sublane multiple
    p = n_pad * n_pad
    tsize = num_steps                          # number of histogram bins (t in [-1, 1])
    t_pad = ((tsize + 127) // 128) * 128       # lane-pad the bin axis
    step = 2.0 / (num_steps - 1)
    eps = 1.0 / num_steps
    # TODO(synk): torch's arange(-1, 1+step, step) can yield tsize = num_steps+1
    # depending on fp rounding; we use exactly num_steps bins.

    feat_p = jnp.zeros((n_pad, d), jnp.float32).at[:b, :].set(features)

    # Host-built, lane-dense pair masks (rows: 0=positive, 1=negative pairs over
    # the strict upper triangle of real rows; pairs p = i*n_pad + j on lanes).
    cls_p = jnp.full((n_pad,), -1, jnp.int32).at[:b].set(classes)
    eq = cls_p[:, None] == cls_p[None, :]
    r = jnp.arange(n_pad)
    upper = (r[None, :] > r[:, None]) & (r[:, None] < b) & (r[None, :] < b)
    pos = (eq & upper).astype(jnp.float32).reshape(1, p)
    neg = ((~eq) & upper).astype(jnp.float32).reshape(1, p)
    masks = (jnp.zeros((8, p), jnp.float32)
             .at[0:1, :].set(pos)
             .at[1:2, :].set(neg))

    kernel = functools.partial(_histogram_loss_kernel, n_pad=n_pad, tsize=tsize,
                               t_pad=t_pad, step=step, eps=eps)
    # TODO(synk): for large batches (B >~ 128) add a grid over pair-row blocks
    # with an (8, t_pad) VMEM scratch accumulator (pl.when init/finalize) so the
    # (P, t_pad) working set stays within v7x's 64 MiB VMEM.
    out = pl.pallas_call(
        kernel,
        out_shape=jax.ShapeDtypeStruct((1, 1), jnp.float32),
        in_specs=[
            pl.BlockSpec(memory_space=pltpu.MemorySpace.VMEM),  # features (n_pad, D)
            pl.BlockSpec(memory_space=pltpu.MemorySpace.VMEM),  # pair masks (8, n_pad^2)
        ],
        out_specs=pl.BlockSpec(memory_space=pltpu.MemorySpace.VMEM),
    )(feat_p, masks)
    return out[0, 0]


if __name__ == "__main__":
    key = jax.random.PRNGKey(0)
    B, D, num_classes = 8, 32, 4
    features = jax.random.normal(key, (B, D), dtype=jnp.float32)
    # Deterministic labels: guarantees both positive and negative pairs exist.
    classes = jnp.arange(B, dtype=jnp.int32) % num_classes

    loss = histogram_loss(features, classes)      # num_steps = 151 (module default)
    loss = jax.block_until_ready(loss)
    assert bool(jnp.isfinite(loss)), "loss is not finite"
    print("KERNEL_OK")
</pallas_src>

<mosaic_0001>
module attributes {stable_mosaic.version = 11 : i64} {
  func.func @_histogram_loss_kernel(%arg0: memref<8x32xf32, #tpu.memory_space<vmem>>, %arg1: memref<8x64xf32, #tpu.memory_space<vmem>>, %arg2: memref<1x1xf32, #tpu.memory_space<vmem>>) attributes {dimension_semantics = [], scalar_prefetch = 0 : i64, scratch_operands = 0 : i64, tpu.core_type = #tpu.core_type<tc>} {
    %c0 = arith.constant 0 : index
    %c0_0 = arith.constant 0 : index
    %0 = vector.load %arg0[%c0, %c0_0] : memref<8x32xf32, #tpu.memory_space<vmem>>, vector<8x32xf32>
    %1 = arith.mulf %0, %0 : vector<8x32xf32>
    %cst = arith.constant dense<0.000000e+00> : vector<8xf32>
    %2 = vector.multi_reduction <add>, %1, %cst [1] : vector<8x32xf32> to vector<8xf32>
    %3 = vector.shape_cast %2 : vector<8xf32> to vector<8x1xf32>
    %cst_1 = arith.constant 9.99999996E-13 : f32
    %4 = vector.broadcast %cst_1 : f32 to vector<8x1xf32>
    %5 = arith.addf %3, %4 : vector<8x1xf32>
    %6 = math.rsqrt %5 : vector<8x1xf32>
    %7 = vector.broadcast %6 : vector<8x1xf32> to vector<8x32xf32>
    %8 = arith.mulf %0, %7 : vector<8x32xf32>
    %cst_2 = arith.constant dense<0.000000e+00> : vector<8x8xf32>
    %9 = tpu.matmul %8, %8, %cst_2 {dimension_numbers = #tpu.dot_dimension_numbers<[1], [1], [0], [0], [0, 0, 1, 0], [], []>} : vector<8x32xf32>, vector<8x32xf32>, vector<8x8xf32> -> vector<8x8xf32>
    %10 = vector.shape_cast %9 : vector<8x8xf32> to vector<1x8x8xf32>
    %11 = vector.shape_cast %10 : vector<1x8x8xf32> to vector<1x8x8xf32>
    %12 = vector.broadcast %11 : vector<1x8x8xf32> to vector<8x8x8xf32>
    %13 = vector.shape_cast %12 : vector<8x8x8xf32> to vector<64x8xf32>
    %14 = tpu.iota {dimensions = array<i32: 0>} : vector<64x8xi32>
    %15 = tpu.iota {dimensions = array<i32: 1>} : vector<64x8xi32>
    %c8_i32 = arith.constant 8 : i32
    %16 = vector.broadcast %c8_i32 : i32 to vector<64x8xi32>
    %17 = arith.muli %15, %16 : vector<64x8xi32>
    %18 = arith.cmpi sge, %14, %17 : vector<64x8xi32>
    %c1_i32 = arith.constant 1 : i32
    %19 = vector.broadcast %c1_i32 : i32 to vector<64x8xi32>
    %20 = arith.addi %15, %19 : vector<64x8xi32>
    %c8_i32_3 = arith.constant 8 : i32
    %21 = vector.broadcast %c8_i32_3 : i32 to vector<64x8xi32>
    %22 = arith.muli %20, %21 : vector<64x8xi32>
    %23 = arith.cmpi slt, %14, %22 : vector<64x8xi32>
    %24 = arith.andi %18, %23 : vector<64x8xi1>
    %cst_4 = arith.constant 0.000000e+00 : f32
    %25 = vector.broadcast %cst_4 : f32 to vector<64x8xf32>
    %26 = arith.select %24, %13, %25 : vector<64x8xi1>, vector<64x8xf32>
    %cst_5 = arith.constant dense<0.000000e+00> : vector<64xf32>
    %27 = vector.multi_reduction <add>, %26, %cst_5 [1] : vector<64x8xf32> to vector<64xf32>
    %28 = vector.shape_cast %27 : vector<64xf32> to vector<64x1xf32>
    %cst_6 = arith.constant 0.0133333337 : f32
    %29 = vector.broadcast %cst_6 : f32 to vector<64x1xf32>
    %30 = arith.divf %28, %29 : vector<64x1xf32>
    %31 = math.floor %30 : vector<64x1xf32>
    %cst_7 = arith.constant 0.0133333337 : f32
    %32 = vector.broadcast %cst_7 : f32 to vector<64x1xf32>
    %33 = arith.mulf %31, %32 : vector<64x1xf32>
    %34 = tpu.iota {dimensions = array<i32: 1>} : vector<1x256xi32>
    %35 = arith.sitofp %34 : vector<1x256xi32> to vector<1x256xf32>
    %cst_8 = arith.constant 0.0133333337 : f32
    %36 = vector.broadcast %cst_8 : f32 to vector<1x256xf32>
    %37 = arith.mulf %35, %36 : vector<1x256xf32>
    %cst_9 = arith.constant 1.000000e+00 : f32
    %38 = vector.broadcast %cst_9 : f32 to vector<1x256xf32>
    %39 = arith.subf %37, %38 : vector<1x256xf32>
    %c151_i32 = arith.constant 151 : i32
    %40 = vector.broadcast %c151_i32 : i32 to vector<1x256xi32>
    %41 = arith.cmpi slt, %34, %40 : vector<1x256xi32>
    %c150_i32 = arith.constant 150 : i32
    %42 = vector.broadcast %c150_i32 : i32 to vector<1x256xi32>
    %43 = arith.cmpi slt, %34, %42 : vector<1x256xi32>
    %cst_10 = arith.constant 0.0133333337 : f32
    %44 = vector.broadcast %cst_10 : f32 to vector<1x256xf32>
    %45 = arith.subf %39, %44 : vector<1x256xf32>
    %46 = vector.broadcast %33 : vector<64x1xf32> to vector<64x256xf32>
    %47 = vector.broadcast %45 : vector<1x256xf32> to vector<64x256xf32>
    %48 = arith.subf %46, %47 : vector<64x256xf32>
    %cst_11 = arith.constant -0.00662251655 : f32
    %49 = vector.broadcast %cst_11 : f32 to vector<64x256xf32>
    %50 = arith.cmpf ogt, %48, %49 : vector<64x256xf32>
    %cst_12 = arith.constant 0.00662251655 : f32
    %51 = vector.broadcast %cst_12 : f32 to vector<64x256xf32>
    %52 = arith.cmpf olt, %48, %51 : vector<64x256xf32>
    %53 = arith.andi %50, %52 : vector<64x256xi1>
    %54 = vector.broadcast %41 : vector<1x256xi1> to vector<64x256xi1>
    %55 = arith.andi %53, %54 : vector<64x256xi1>
    %cst_13 = arith.constant 0.00671081664 : f32
    %56 = vector.broadcast %cst_13 : f32 to vector<64x256xf32>
    %57 = arith.cmpf ogt, %48, %56 : vector<64x256xf32>
    %cst_14 = arith.constant 0.0199558493 : f32
    %58 = vector.broadcast %cst_14 : f32 to vector<64x256xf32>
    %59 = arith.cmpf olt, %48, %58 : vector<64x256xf32>
    %60 = arith.andi %57, %59 : vector<64x256xi1>
    %61 = vector.broadcast %43 : vector<1x256xi1> to vector<64x256xi1>
    %62 = arith.andi %60, %61 : vector<64x256xi1>
    %63 = vector.broadcast %28 : vector<64x1xf32> to vector<64x256xf32>
    %64 = vector.broadcast %39 : vector<1x256xf32> to vector<64x256xf32>
    %65 = arith.subf %63, %64 : vector<64x256xf32>
    %cst_15 = arith.constant 0.0133333337 : f32
    %66 = vector.broadcast %cst_15 : f32 to vector<64x256xf32>
    %67 = arith.addf %65, %66 : vector<64x256xf32>
    %cst_16 = arith.constant 7.500000e+01 : f32
    %68 = vector.broadcast %cst_16 : f32 to vector<64x256xf32>
    %69 = arith.mulf %67, %68 : vector<64x256xf32>
    %cst_17 = arith.constant 2.000000e+00 : f32
    %70 = vector.broadcast %cst_17 : f32 to vector<64x256xf32>
    %71 = arith.subf %70, %69 : vector<64x256xf32>
    %cst_18 = arith.constant 0.000000e+00 : f32
    %72 = vector.broadcast %cst_18 : f32 to vector<64x256xf32>
    %73 = arith.select %55, %69, %72 : vector<64x256xi1>, vector<64x256xf32>
    %74 = arith.select %62, %71, %73 : vector<64x256xi1>, vector<64x256xf32>
    %c0_19 = arith.constant 0 : index
    %c0_20 = arith.constant 0 : index
    %75 = vector.load %arg1[%c0_19, %c0_20] : memref<8x64xf32, #tpu.memory_space<vmem>>, vector<8x64xf32>
    %cst_21 = arith.constant dense<0.000000e+00> : vector<8x256xf32>
    %76 = tpu.matmul %75, %74, %cst_21 {dimension_numbers = #tpu.dot_dimension_numbers<[1], [0], [0], [1], [0, 0, 1, 1], [], []>} : vector<8x64xf32>, vector<64x256xf32>, vector<8x256xf32> -> vector<8x256xf32>
    %77 = vector.extract_strided_slice %75 {offsets = [0, 0], sizes = [1, 64], strides = [1, 1]} : vector<8x64xf32> to vector<1x64xf32>
    %cst_22 = arith.constant dense<0.000000e+00> : vector<1xf32>
    %78 = vector.multi_reduction <add>, %77, %cst_22 [1] : vector<1x64xf32> to vector<1xf32>
    %79 = vector.shape_cast %78 : vector<1xf32> to vector<1x1xf32>
    %80 = vector.extract_strided_slice %75 {offsets = [1, 0], sizes = [1, 64], strides = [1, 1]} : vector<8x64xf32> to vector<1x64xf32>
    %cst_23 = arith.constant dense<0.000000e+00> : vector<1xf32>
    %81 = vector.multi_reduction <add>, %80, %cst_23 [1] : vector<1x64xf32> to vector<1xf32>
    %82 = vector.shape_cast %81 : vector<1xf32> to vector<1x1xf32>
    %cst_24 = arith.constant 1.000000e+00 : f32
    %83 = vector.broadcast %cst_24 : f32 to vector<1x1xf32>
    %84 = arith.maximumf %79, %83 : vector<1x1xf32>
    %cst_25 = arith.constant 1.000000e+00 : f32
    %85 = vector.broadcast %cst_25 : f32 to vector<1x1xf32>
    %86 = arith.divf %85, %84 : vector<1x1xf32>
    %cst_26 = arith.constant 1.000000e+00 : f32
    %87 = vector.broadcast %cst_26 : f32 to vector<1x1xf32>
    %88 = arith.maximumf %82, %87 : vector<1x1xf32>
    %cst_27 = arith.constant 1.000000e+00 : f32
    %89 = vector.broadcast %cst_27 : f32 to vector<1x1xf32>
    %90 = arith.divf %89, %88 : vector<1x1xf32>
    %91 = tpu.iota {dimensions = array<i32: 0>} : vector<256x256xi32>
    %92 = tpu.iota {dimensions = array<i32: 1>} : vector<256x256xi32>
    %93 = arith.cmpi sge, %91, %92 : vector<256x256xi32>
    %cst_28 = arith.constant 1.000000e+00 : f32
    %cst_29 = arith.constant 0.000000e+00 : f32
    %94 = vector.broadcast %cst_28 : f32 to vector<256x256xf32>
    %95 = vector.broadcast %cst_29 : f32 to vector<256x256xf32>
    %96 = arith.select %93, %94, %95 : vector<256x256xi1>, vector<256x256xf32>
    %cst_30 = arith.constant dense<0.000000e+00> : vector<8x256xf32>
    %97 = tpu.matmul %76, %96, %cst_30 {dimension_numbers = #tpu.dot_dimension_numbers<[1], [0], [0], [1], [0, 0, 1, 1], [], []>} : vector<8x256xf32>, vector<256x256xf32>, vector<8x256xf32> -> vector<8x256xf32>
    %98 = vector.extract_strided_slice %76 {offsets = [0, 0], sizes = [1, 256], strides = [1, 1]} : vector<8x256xf32> to vector<1x256xf32>
    %99 = vector.extract_strided_slice %97 {offsets = [1, 0], sizes = [1, 256], strides = [1, 1]} : vector<8x256xf32> to vector<1x256xf32>
    %100 = arith.mulf %98, %99 : vector<1x256xf32>
    %101 = vector.shape_cast %100 : vector<1x256xf32> to vector<1x1x256xf32>
    %cst_31 = arith.constant dense<0.000000e+00> : vector<1xf32>
    %102 = vector.multi_reduction <add>, %101, %cst_31 [1, 2] : vector<1x1x256xf32> to vector<1xf32>
    %103 = vector.shape_cast %102 : vector<1xf32> to vector<1x1x1xf32>
    %104 = vector.extract %103[0, 0, 0] : f32 from vector<1x1x1xf32>
    %105 = vector.broadcast %104 : f32 to vector<1x1xf32>
    %106 = arith.mulf %105, %86 : vector<1x1xf32>
    %107 = arith.mulf %106, %90 : vector<1x1xf32>
    %c0_32 = arith.constant 0 : index
    %c0_33 = arith.constant 0 : index
    %108 = vector.load %arg2[%c0_32, %c0_33] : memref<1x1xf32, #tpu.memory_space<vmem>>, vector<1x1xf32>
    tpu.vector_store %arg2[%c0_32, %c0_33], %107 {strides = array<i32>} : memref<1x1xf32, #tpu.memory_space<vmem>>, vector<1x1xf32>,
    return
  }
}

</mosaic_0001>

<bundles_post_ra>
// kernel: tpu_custom_call.1
= control target key start
LH: loop header
LB: loop body
LE: loop exit
PB: predicated region body
PF: predicated region fallthrough
CT: control target
= control target key end

     0   :  { %7 = vsyncpa [#allocation3], 0  ;;  %s1361_s0 = inlined_call_operand.hbm [shape: f32[8,32], index: 0, kind: input, shape index: {}]   ;;  %s1362_s1 = inlined_call_operand.hbm [shape: f32[8,64], index: 1, kind: input, shape index: {}]   ;;  %s1363_s2 = inlined_call_operand.hbm [shape: f32[1,1], index: 2, kind: output, shape index: {}]  }
   0x1   :  { %8 = vsyncpa [#allocation6], 0 }
   0x2   :  { %9 = vsyncpa [#allocation4], 0  ;;  %s959_s9 = smov [#allocation2]   ;;  %s960_s11 = smov [#allocation5]  }
   0x3   :  { %s16_s10 = sshll.u32 %s959_s9, 4  ;;  %s26_s12 = sshll.u32 %s960_s11, 4  ;;  %s17_s10 = int_to_ptr.vmem [resolvable:$true] %s16_s10  ;;  %s27_s12 = int_to_ptr.vmem [resolvable:$true] %s26_s12 }
   0x4   :  { %s901_s13 = scalar_lea.vmem %s17_s10, 128  ;;  %p906_p1 = scmp.lt.s32.totalorder %s17_s10, %s17_s10 }
   0x5   :  { %p902_p0 = scmp.ne.s32.totalorder %s17_s10, %s901_s13  ;;  %p907_p2 = scmp.lt.s32.totalorder %s901_s13, %s901_s13 }
   0x7   :  { %p908_p3 = por %p907_p2, %p906_p1 }
   0x9   :  { %p909_p4 = pnand %p908_p3, %p902_p0 }
   0xb   :  { %912 = shalt.err (!%p909_p4)
}
   0xc   :  { %19 = dma.hbm_to_vmem [thread:$0]  %s1361_s0, 128, %s17_s10, [#allocation3]  }
   0xd   :  { %s921_s16 = scalar_lea.vmem %s27_s12, 128  ;;  %p926_p6 = scmp.lt.s32.totalorder %s27_s12, %s27_s12 }
   0xe   :  { %p922_p5 = scmp.ne.s32.totalorder %s27_s12, %s921_s16  ;;  %p927_p7 = scmp.lt.s32.totalorder %s921_s16, %s921_s16 }
  0x10   :  { %p928_p8 = por %p927_p7, %p926_p6 }
  0x12   :  { %p929_p9 = pnand %p928_p8, %p922_p5 }
  0x14   :  { %932 = shalt.err (!%p929_p9)
}
  0x15   :  { %29 = dma.hbm_to_vmem [thread:$0]  %s1362_s1, 128, %s27_s12, [#allocation6]  }
  0x16   :  { %953 = dma.done.wait [#allocation3], 128  }
  0x17   :  { %954 = vsyncadd [#allocation3], 4294967168 }
  0x18   :  { %955 = dma.done.wait [#allocation6], 128  }
  0x19   :  { %956 = vsyncadd [#allocation6], 4294967168  ;;  %v36_v0 = vld [vmem:[#allocation2] sm:$0xff]  ;;  %vm38_vm0 = vcmask 261120   ;;  %v961_v3 = vmov 0.0   ;;  %vm962_vm1 = vmmov 0   ;;  %v118_v8 = vlaneseq }
  0x1a   :  { %v37_v1 = vmul.f32 %v36_v0, %v36_v0  ;;  %874 = vmatprep.subr.mxu1 %v961_v3  ;;  %717 = vmatprep.subr.mxu0 %v961_v3  ;;  %vm164_vm12 = vcmask 64512   ;;  %v963_v46 = vmov 1.0   ;;  %s964_s1 = smov [#allocation7]  }
  0x1b   :  { %876 = vmatprep.mubr.msk.f32.mxu1 %vm962_vm1, %v961_v3  ;;  %v990_v9 = vand.u32 127, %v118_v8  ;;  %v992_v10 = vshrl.u32 %v118_v8, 7  ;;  %s823_s19 = sshll.u32 %s964_s1, 4  ;;  %s824_s19 = int_to_ptr.vmem [resolvable:$true] %s823_s19 }
  0x1c   :  { %v39_v2 = vsel %vm38_vm0, %v37_v1, 0.0  ;;  %s933_s20 = scalar_lea.vmem %s824_s19, 16  ;;  %s937_s21 = scalar_lea.vmem %s824_s19, 32 }
  0x1d   :  { %40 = vadd.xlane.f32.xlu0 %v39_v2  ;;  %v138_v11 = vadd.s32 1, %v990_v9  ;;  %v996_v12 = vadd.s32 56, %v992_v10  ;;  %v129_v13 = vmul.u32 8, %v990_v9  ;;  %v1000_v15 = vadd.s32 48, %v992_v10  ;;  %p934_p10 = scmp.ne.s32.totalorder %s824_s19, %s933_s20  ;;  %p938_p11 = scmp.lt.s32.totalorder %s824_s19, %s824_s19 }
  0x1e   :  { %v1003_v16 = vadd.s32 40, %v992_v10  ;;  %v1006_v17 = vadd.s32 32, %v992_v10  ;;  %v1015_v18 = vadd.s32 24, %v992_v10  ;;  %v1024_v20 = vadd.s32 16, %v992_v10  ;;  %p939_p12 = scmp.lt.s32.totalorder %s937_s21, %s933_s20 }
  0x1f   :  { %v139_v14 = vmul.u32 8, %v138_v11  ;;  %vm137_vm2 = vcmp.ge.s32.totalorder %v996_v12, %v129_v13  ;;  %vm136_vm4 = vcmp.ge.s32.totalorder %v1000_v15, %v129_v13  ;;  %v1037_v24 = vadd.s32 8, %v992_v10 }
  0x20   :  { %vm135_vm6 = vcmp.ge.s32.totalorder %v1003_v16, %v129_v13  ;;  %vm134_vm9 = vcmp.ge.s32.totalorder %v1006_v17, %v129_v13  ;;  %vm133_vm15 = vcmp.ge.s32.totalorder %v1015_v18, %v129_v13  ;;  %vm132_vm1 = vcmp.ge.s32.totalorder %v1024_v20, %v129_v13  ;;  %p940_p13 = por %p939_p12, %p938_p11 }
  0x21   :  { %vm147_vm3 = vcmp.lt.s32.totalorder %v996_v12, %v139_v14  ;;  %vm146_vm5 = vcmp.lt.s32.totalorder %v1000_v15, %v139_v14  ;;  %vm145_vm7 = vcmp.lt.s32.totalorder %v1003_v16, %v139_v14  ;;  %vm144_vm10 = vcmp.lt.s32.totalorder %v1006_v17, %v139_v14 }
  0x22   :  { %vm1017_vm8 = vmand %vm137_vm2, %vm147_vm3  ;;  %vm142_vm2 = vcmp.lt.s32.totalorder %v1024_v20, %v139_v14  ;;  %v572_v42 = vadd.s32 120, %v992_v10  ;;  %v571_v43 = vadd.s32 112, %v992_v10  ;;  %v570_v44 = vadd.s32 104, %v992_v10  ;;  %p941_p0 = pnand %p940_p13, %p934_p10 }
  0x23   :  { %vm154_vm11 = vmand %vm136_vm4, %vm146_vm5  ;;  %vm131_vm5 = vcmp.ge.s32.totalorder %v1037_v24, %v129_v13  ;;  %v569_v45 = vadd.s32 96, %v992_v10  ;;  %v568_v47 = vadd.s32 88, %v992_v10  ;;  %v567_v48 = vadd.s32 80, %v992_v10 }
  0x24   :  { %vm1026_vm13 = vmand %vm135_vm6, %vm145_vm7  ;;  %vm141_vm6 = vcmp.lt.s32.totalorder %v1037_v24, %v139_v14  ;;  %vm130_vm7 = vcmp.ge.s32.totalorder %v992_v10, %v129_v13  ;;  %v566_v49 = vadd.s32 72, %v992_v10  ;;  %v565_v50 = vadd.s32 64, %v992_v10 }
  0x25   :  { %vm1030_vm14 = vmand %vm134_vm9, %vm144_vm10  ;;  %v588_v51 = vadd.s32 248, %v992_v10  ;;  %v1117_v52 = vadd.s32 128, %v990_v9  ;;  %v587_v53 = vadd.s32 240, %v992_v10  ;;  %v586_v54 = vadd.s32 232, %v992_v10 }
  0x26   :  { %vm150_vm4 = vmand %vm132_vm1, %vm142_vm2  ;;  %vm607_vm1 = vcmp.ge.s32.totalorder %v566_v49, %v990_v9  ;;  %vm605_vm2 = vcmp.ge.s32.totalorder %v565_v50, %v990_v9  ;;  %v585_v55 = vadd.s32 224, %v992_v10  ;;  %v584_v56 = vadd.s32 216, %v992_v10 }
  0x27   :  { %vm149_vm9 = vmand %vm131_vm5, %vm141_vm6  ;;  %vm599_vm5 = vcmp.ge.s32.totalorder %v1003_v16, %v990_v9  ;;  %vm597_vm6 = vcmp.ge.s32.totalorder %v1006_v17, %v990_v9  ;;  %v583_v57 = vadd.s32 208, %v992_v10  ;;  %v582_v58 = vadd.s32 200, %v992_v10 }
  0x28   :  { %v581_v59 = vadd.s32 192, %v992_v10  ;;  %v580_v60 = vadd.s32 184, %v992_v10  ;;  %v579_v61 = vadd.s32 176, %v992_v10  ;;  %v578_v62 = vadd.s32 168, %v992_v10 }
  0x29   :  { %v577_v63 = vadd.s32 160, %v992_v10  ;;  %v575_v1 = vadd.s32 144, %v992_v10  ;;  %v215_v2 = vcvt.s32.f32 %v990_v9 }
  0xa6   :  { %v41_v4 = vpop.xlane.xlu0 %40 }
  0xa7   :  { %v42_v5 = vadd.f32 1e-12, %v41_v4 }
  0xa9   :  { %887 = vrsqrt.f32 %v42_v5  ;;  %v217_v5 = vmul.f32 0.013333334, %v215_v2 }
  0xab   :  { %v1183_v8 = vadd.f32 -1.0, %v217_v5 }
  0xb6   :  { %v888_v6 = vpop.eup %887 }
  0xb7   :  { %v44_v7 = vmul.f32 %v888_v6, %v36_v0  ;;  %v576_v0 = vadd.s32 152, %v992_v10 }
  0xb9   :  { %875 = vmatpush3.xpose.msk.msra.mxu1 %vm38_vm0, %v44_v7 }
  0xbc   :  { %877 = vmatmul.mubr.msk.f32.vlgmr.msra.gmra.mxu1 %vm38_vm0, %v44_v7  ;;  %vm143_vm0 = vcmp.lt.s32.totalorder %v1015_v18, %v139_v14 }
  0xbd   :  { %544 = vmatprep.mubr.f32.mxu1 %v961_v3  ;;  %vm151_vm3 = vmand %vm133_vm15, %vm143_vm0  ;;  %vm611_vm15 = vcmp.ge.s32.totalorder %v568_v47, %v990_v9  ;;  %vm609_vm0 = vcmp.ge.s32.totalorder %v567_v48, %v990_v9 }
 0x17c   :  { %v114_v22 = vpop.f32.mrf.mxu1 }
 0x17d   :  { %v163_v25 = vsel %vm1017_vm8, %v114_v22, 0.0  ;;  %v162_v26 = vsel %vm154_vm11, %v114_v22, 0.0  ;;  %v161_v30 = vsel %vm1026_vm13, %v114_v22, 0.0  ;;  %v160_v31 = vsel %vm1030_vm14, %v114_v22, 0.0 }
 0x17e   :  { %v878_v27 = vpop.f32.mrf.mxu1  ;;  %v186_v28 = vsel %vm164_vm12, %v163_v25, 0.0  ;;  %v183_v29 = vsel %vm164_vm12, %v162_v26, 0.0  ;;  %vm140_vm8 = vcmp.lt.s32.totalorder %v992_v10, %v139_v14  ;;  %v180_v32 = vsel %vm164_vm12, %v161_v30, 0.0 }
 0x17f   :  { %187 = vadd.xlane.f32.xlu0 %v186_v28  ;;  %184 = vadd.xlane.f32.xlu1 %v183_v29  ;;  %v177_v33 = vsel %vm164_vm12, %v160_v31, 0.0  ;;  %v159_v34 = vsel %vm151_vm3, %v114_v22, 0.0  ;;  %v158_v35 = vsel %vm150_vm4, %v114_v22, 0.0  ;;  %vm148_vm10 = vmand %vm130_vm7, %vm140_vm8  ;;  %v157_v38 = vsel %vm149_vm9, %v114_v22, 0.0 }
 0x180   :  { %v174_v36 = vsel %vm164_vm12, %v159_v34, 0.0  ;;  %v171_v37 = vsel %vm164_vm12, %v158_v35, 0.0  ;;  %v156_v39 = vsel %vm148_vm10, %v114_v22, 0.0  ;;  %v168_v40 = vsel %vm164_vm12, %v157_v38, 0.0 }
 0x181   :  { %v165_v41 = vsel %vm164_vm12, %v156_v39, 0.0  ;;  %vm619_vm11 = vcmp.ge.s32.totalorder %v572_v42, %v990_v9  ;;  %vm617_vm13 = vcmp.ge.s32.totalorder %v571_v43, %v990_v9  ;;  %vm615_vm12 = vcmp.ge.s32.totalorder %v570_v44, %v990_v9 }
 0x182   :  { %840 = vmatpush1.msk.msra.mxu0 %vm619_vm11, %v963_v46  ;;  %vm613_vm14 = vcmp.ge.s32.totalorder %v569_v45, %v990_v9  ;;  %vm603_vm3 = vcmp.ge.s32.totalorder %v996_v12, %v990_v9  ;;  %vm601_vm4 = vcmp.ge.s32.totalorder %v1000_v15, %v990_v9  ;;  %vm595_vm7 = vcmp.ge.s32.totalorder %v1015_v18, %v990_v9 }
 0x183   :  { %181 = vadd.xlane.f32.xlu1 %v180_v32  ;;  %178 = vadd.xlane.f32.xlu0 %v177_v33  ;;  %vm593_vm8 = vcmp.ge.s32.totalorder %v1024_v20, %v990_v9  ;;  %vm591_vm9 = vcmp.ge.s32.totalorder %v1037_v24, %v990_v9  ;;  %vm589_vm10 = vcmp.ge.s32.totalorder %v992_v10, %v990_v9  ;;  %v1195_v24 = vadd.f32 -0.013333334, %v1183_v8 }
 0x184   :  { %719 = vmatprep.subr.mxu0 %v961_v3  ;;  %vm652_vm11 = vcmp.ge.s32.totalorder %v588_v51, %v1117_v52 }
 0x185   :  { %841 = vmatpush1.msk.msra.mxu0 %vm617_vm13, %v963_v46  ;;  %vm650_vm13 = vcmp.ge.s32.totalorder %v587_v53, %v1117_v52 }
 0x186   :  { %721 = vmatprep.subr.mxu0 %v961_v3 }
 0x187   :  { %175 = vadd.xlane.f32.xlu1 %v174_v36  ;;  %172 = vadd.xlane.f32.xlu0 %v171_v37 }
 0x188   :  { %842 = vmatpush1.msk.msra.mxu0 %vm615_vm12, %v963_v46  ;;  %vm648_vm12 = vcmp.ge.s32.totalorder %v586_v54, %v1117_v52 }
 0x189   :  { %723 = vmatprep.subr.mxu0 %v961_v3 }
 0x18a   :  { %843 = vmatpush1.msk.msra.mxu0 %vm613_vm14, %v963_v46  ;;  %vm646_vm14 = vcmp.ge.s32.totalorder %v585_v55, %v1117_v52 }
 0x18b   :  { %169 = vadd.xlane.f32.xlu1 %v168_v40  ;;  %166 = vadd.xlane.f32.xlu0 %v165_v41 }
 0x18c   :  { %725 = vmatprep.subr.mxu0 %v961_v3 }
 0x18d   :  { %844 = vmatpush1.msk.msra.mxu0 %vm611_vm15, %v963_v46  ;;  %vm644_vm15 = vcmp.ge.s32.totalorder %v584_v56, %v1117_v52 }
 0x18e   :  { %727 = vmatprep.subr.mxu0 %v961_v3 }
 0x18f   :  { %845 = vmatpush1.msk.msra.mxu0 %vm609_vm0, %v963_v46  ;;  %vm642_vm0 = vcmp.ge.s32.totalorder %v583_v57, %v1117_v52 }
 0x190   :  { %729 = vmatprep.subr.mxu0 %v961_v3 }
 0x191   :  { %846 = vmatpush1.msk.msra.mxu0 %vm607_vm1, %v963_v46  ;;  %vm640_vm1 = vcmp.ge.s32.totalorder %v582_v58, %v1117_v52 }
 0x192   :  { %731 = vmatprep.subr.mxu0 %v961_v3 }
 0x193   :  { %847 = vmatpush1.msk.msra.mxu0 %vm605_vm2, %v963_v46  ;;  %vm638_vm2 = vcmp.ge.s32.totalorder %v581_v59, %v1117_v52 }
 0x194   :  { %733 = vmatprep.subr.mxu0 %v961_v3 }
 0x195   :  { %848 = vmatpush1.msk.msra.mxu0 %vm603_vm3, %v963_v46  ;;  %vm636_vm3 = vcmp.ge.s32.totalorder %v580_v60, %v1117_v52 }
 0x196   :  { %735 = vmatprep.subr.mxu0 %v961_v3 }
 0x197   :  { %849 = vmatpush1.msk.msra.mxu0 %vm601_vm4, %v963_v46  ;;  %vm634_vm4 = vcmp.ge.s32.totalorder %v579_v61, %v1117_v52 }
 0x198   :  { %737 = vmatprep.subr.mxu0 %v961_v3 }
 0x199   :  { %850 = vmatpush1.msk.msra.mxu0 %vm599_vm5, %v963_v46  ;;  %vm632_vm5 = vcmp.ge.s32.totalorder %v578_v62, %v1117_v52 }
 0x19a   :  { %739 = vmatprep.subr.mxu0 %v961_v3 }
 0x19b   :  { %851 = vmatpush1.msk.msra.mxu0 %vm597_vm6, %v963_v46  ;;  %vm630_vm6 = vcmp.ge.s32.totalorder %v577_v63, %v1117_v52 }
 0x19c   :  { %741 = vmatprep.subr.mxu0 %v961_v3 }
 0x19d   :  { %852 = vmatpush1.msk.msra.mxu0 %vm595_vm7, %v963_v46  ;;  %vm628_vm7 = vcmp.ge.s32.totalorder %v576_v0, %v1117_v52 }
 0x19e   :  { %743 = vmatprep.subr.mxu0 %v961_v3 }
 0x19f   :  { %853 = vmatpush1.msk.msra.mxu0 %vm593_vm8, %v963_v46  ;;  %vm626_vm8 = vcmp.ge.s32.totalorder %v575_v1, %v1117_v52 }
 0x1a0   :  { %745 = vmatprep.subr.mxu0 %v961_v3 }
 0x1a1   :  { %854 = vmatpush1.msk.msra.mxu0 %vm591_vm9, %v963_v46  ;;  %vm222_vm9 = vcmp.lt.s32.totalorder %v1117_v52, 151 }
 0x1a2   :  { %747 = vmatprep.subr.mxu0 %v961_v3  ;;  %v216_v3 = vcvt.s32.f32 %v1117_v52 }
 0x1a3   :  { %855 = vmatpush1.msk.msra.mxu0 %vm589_vm10, %v963_v46  ;;  %vm1364_vm10 = vcmp.lt.s32.totalorder %v1117_v52, 150 }
 0x1a4   :  { %856 = vmatprep.subr.msk.mxu0 %vm652_vm11, %v963_v46  ;;  %v218_v6 = vmul.f32 0.013333334, %v216_v3 }
 0x1a5   :  { %750 = vmatpush2.msra.mxu0 %v963_v46 }
 0x1a6   :  { %857 = vmatprep.subr.msk.mxu0 %vm650_vm13, %v963_v46  ;;  %v1185_v11 = vadd.f32 -1.0, %v218_v6 }
 0x1a7   :  { %752 = vmatpush2.msra.mxu0 %v963_v46 }
 0x1a8   :  { %858 = vmatprep.subr.msk.mxu0 %vm648_vm12, %v963_v46  ;;  %v1189_v15 = vadd.f32 -0.013333334, %v1185_v11 }
 0x1a9   :  { %754 = vmatpush2.msra.mxu0 %v963_v46 }
 0x1aa   :  { %859 = vmatprep.subr.msk.mxu0 %vm646_vm14, %v963_v46 }
 0x1ab   :  { %756 = vmatpush2.msra.mxu0 %v963_v46 }
 0x1ac   :  { %860 = vmatprep.subr.msk.mxu0 %vm644_vm15, %v963_v46 }
 0x1ad   :  { %758 = vmatpush2.msra.mxu0 %v963_v46 }
 0x1ae   :  { %861 = vmatprep.subr.msk.mxu0 %vm642_vm0, %v963_v46 }
 0x1af   :  { %760 = vmatpush2.msra.mxu0 %v963_v46 }
 0x1b0   :  { %862 = vmatprep.subr.msk.mxu0 %vm640_vm1, %v963_v46 }
 0x1b1   :  { %762 = vmatpush2.msra.mxu0 %v963_v46 }
 0x1b2   :  { %863 = vmatprep.subr.msk.mxu0 %vm638_vm2, %v963_v46 }
 0x1b3   :  { %764 = vmatpush2.msra.mxu0 %v963_v46 }
 0x1b4   :  { %864 = vmatprep.subr.msk.mxu0 %vm636_vm3, %v963_v46 }
 0x1b5   :  { %766 = vmatpush2.msra.mxu0 %v963_v46 }
 0x1b6   :  { %865 = vmatprep.subr.msk.mxu0 %vm634_vm4, %v963_v46 }
 0x1b7   :  { %768 = vmatpush2.msra.mxu0 %v963_v46 }
 0x1b8   :  { %866 = vmatprep.subr.msk.mxu0 %vm632_vm5, %v963_v46 }
 0x1b9   :  { %770 = vmatpush2.msra.mxu0 %v963_v46 }
 0x1ba   :  { %867 = vmatprep.subr.msk.mxu0 %vm630_vm6, %v963_v46 }
 0x1bb   :  { %772 = vmatpush2.msra.mxu0 %v963_v46 }
 0x1bc   :  { %868 = vmatprep.subr.msk.mxu0 %vm628_vm7, %v963_v46 }
 0x1bd   :  { %774 = vmatpush2.msra.mxu0 %v963_v46 }
 0x1be   :  { %869 = vmatprep.subr.msk.mxu0 %vm626_vm8, %v963_v46 }
 0x1bf   :  { %776 = vmatpush2.msra.mxu0 %v963_v46 }
 0x208   :  { %v188_v4 = vpop.xlane.xlu0 %187  ;;  %v185_v9 = vpop.xlane.xlu1 %184 }
 0x209   :  { %v197_v7 = vmul.f32 75.0, %v188_v4  ;;  %v196_v13 = vmul.f32 75.0, %v185_v9  ;;  %v393_v14 = vsub.f32 %v188_v4, %v1183_v8  ;;  %v394_v17 = vsub.f32 %v188_v4, %v1185_v11 }
 0x20a   :  { %v391_v20 = vsub.f32 %v185_v9, %v1183_v8  ;;  %v392_v21 = vsub.f32 %v185_v9, %v1185_v11 }
 0x20b   :  { %v205_v12 = vfloor.f32 %v197_v7  ;;  %v204_v19 = vfloor.f32 %v196_v13  ;;  %v409_v22 = vadd.f32 0.013333334, %v393_v14  ;;  %v410_v26 = vadd.f32 0.013333334, %v394_v17 }
 0x20c   :  { %v182_v18 = vpop.xlane.xlu1 %181  ;;  %v407_v28 = vadd.f32 0.013333334, %v391_v20  ;;  %v408_v29 = vadd.f32 0.013333334, %v392_v21  ;;  %v1199_v32 = vpop.xlane.xlu0 %178 }
 0x20d   :  { %v213_v16 = vmul.f32 0.013333334, %v205_v12  ;;  %v195_v23 = vmul.f32 75.0, %v182_v18  ;;  %v212_v27 = vmul.f32 0.013333334, %v204_v19  ;;  %v425_v30 = vmul.f32 75.0, %v409_v22 }
 0x20e   :  { %v389_v31 = vsub.f32 %v182_v18, %v1183_v8  ;;  %v426_v35 = vmul.f32 75.0, %v410_v26  ;;  %v1205_v37 = vmul.f32 75.0, %v407_v28  ;;  %v424_v38 = vmul.f32 75.0, %v408_v29 }
 0x20f   :  { %v242_v25 = vsub.f32 %v213_v16, %v1189_v15  ;;  %v203_v33 = vfloor.f32 %v195_v23  ;;  %v241_v34 = vsub.f32 %v213_v16, %v1195_v24  ;;  %v240_v36 = vsub.f32 %v212_v27, %v1189_v15 }
 0x210   :  { %v194_v39 = vmul.f32 75.0, %v1199_v32  ;;  %v1208_v40 = vpop.xlane.xlu1 %175  ;;  %v441_v41 = vsub.f32 2.0, %v425_v30  ;;  %v239_v42 = vsub.f32 %v212_v27, %v1195_v24  ;;  %v405_v43 = vadd.f32 0.013333334, %v389_v31  ;;  %v1232_v0 = vpop.xlane.xlu0 %172 }
 0x211   :  { %vm258_vm11 = vcmp.gt.f32.partialorder %v242_v25, -0.0066225166  ;;  %vm274_vm13 = vcmp.lt.f32.partialorder %v242_v25, 0.0066225166  ;;  %vm326_vm15 = vcmp.gt.f32.partialorder %v242_v25, 0.0067108166  ;;  %v390_v47 = vsub.f32 %v182_v18, %v1185_v11 }
 0x212   :  { %vm290_vm12 = vmand %vm258_vm11, %vm274_vm13  ;;  %v211_v45 = vmul.f32 0.013333334, %v203_v33  ;;  %vm342_vm0 = vcmp.lt.f32.partialorder %v242_v25, 0.01995585  ;;  %v193_v49 = vmul.f32 75.0, %v1208_v40  ;;  %v442_v50 = vsub.f32 2.0, %v426_v35 }
 0x213   :  { %vm1213_vm14 = vmand %vm290_vm12, %vm222_vm9  ;;  %vm257_vm2 = vcmp.gt.f32.partialorder %v241_v34, -0.0066225166  ;;  %vm273_vm3 = vcmp.lt.f32.partialorder %v241_v34, 0.0066225166  ;;  %v202_v51 = vfloor.f32 %v194_v39  ;;  %vm325_vm5 = vcmp.gt.f32.partialorder %v241_v34, 0.0067108166 }
 0x214   :  { %v458_v48 = vsel %vm1213_vm14, %v426_v35, 0.0  ;;  %vm358_vm1 = vmand %vm326_vm15, %vm342_vm0  ;;  %vm341_vm6 = vcmp.lt.f32.partialorder %v241_v34, 0.01995585  ;;  %vm256_vm7 = vcmp.gt.f32.partialorder %v240_v36, -0.0066225166  ;;  %v439_v53 = vsub.f32 2.0, %v1205_v37  ;;  %v1265_v23 = vpop.xlane.xlu1 %169 }
 0x215   :  { %vm378_vm4 = vmand %vm358_vm1, %vm1364_vm10  ;;  %v387_v54 = vsub.f32 %v1199_v32, %v1183_v8  ;;  %vm272_vm11 = vcmp.lt.f32.partialorder %v240_v36, 0.0066225166  ;;  %v238_v56 = vsub.f32 %v211_v45, %v1189_v15  ;;  %vm324_vm12 = vcmp.gt.f32.partialorder %v240_v36, 0.0067108166 }
 0x216   :  { %v474_v55 = vsel %vm378_vm4, %v442_v50, %v458_v48  ;;  %vm289_vm8 = vmand %vm257_vm2, %vm273_vm3  ;;  %vm340_vm14 = vcmp.lt.f32.partialorder %v240_v36, 0.01995585  ;;  %v406_v58 = vadd.f32 0.013333334, %v390_v47  ;;  %v1227_v59 = vmul.f32 75.0, %v405_v43 }
 0x217   :  { %496 = vmatprep.subr.mxu1 %v474_v55  ;;  %vm357_vm13 = vmand %vm325_vm5, %vm341_vm6  ;;  %v457_v57 = vsel %vm289_vm8, %v425_v30, 0.0  ;;  %v388_v60 = vsub.f32 %v1199_v32, %v1185_v11  ;;  %v210_v62 = vmul.f32 0.013333334, %v202_v51  ;;  %v201_v63 = vfloor.f32 %v193_v49 }
 0x218   :  { %v473_v61 = vsel %vm357_vm13, %v441_v41, %v457_v57  ;;  %vm288_vm15 = vmand %vm256_vm7, %vm272_vm11  ;;  %vm255_vm1 = vcmp.gt.f32.partialorder %v239_v42, -0.0066225166  ;;  %vm271_vm2 = vcmp.lt.f32.partialorder %v239_v42, 0.0066225166  ;;  %v440_v2 = vsub.f32 2.0, %v424_v38  ;;  %v1284_v41 = vpop.xlane.xlu0 %166 }
 0x219   :  { %497 = vmatpush1.msra.mxu1 %v473_v61  ;;  %vm1236_vm0 = vmand %vm288_vm15, %vm222_vm9  ;;  %vm323_vm4 = vcmp.gt.f32.partialorder %v239_v42, 0.0067108166  ;;  %vm339_vm5 = vcmp.lt.f32.partialorder %v239_v42, 0.01995585  ;;  %v237_v4 = vsub.f32 %v211_v45, %v1195_v24  ;;  %v403_v5 = vadd.f32 0.013333334, %v387_v54 }
 0x21a   :  { %vm356_vm3 = vmand %vm324_vm12, %vm340_vm14  ;;  %v456_v3 = vsel %vm1236_vm0, %v424_v38, 0.0  ;;  %vm254_vm7 = vcmp.gt.f32.partialorder %v238_v56, -0.0066225166  ;;  %vm270_vm8 = vcmp.lt.f32.partialorder %v238_v56, 0.0066225166  ;;  %v422_v6 = vmul.f32 75.0, %v406_v58 }
 0x21b   :  { %vm376_vm6 = vmand %vm356_vm3, %vm1364_vm10  ;;  %v385_v7 = vsub.f32 %v1208_v40, %v1183_v8  ;;  %v192_v9 = vmul.f32 75.0, %v1232_v0  ;;  %v236_v13 = vsub.f32 %v210_v62, %v1189_v15  ;;  %vm322_vm12 = vcmp.gt.f32.partialorder %v238_v56, 0.0067108166  ;;  %v475_v42 = vld [vmem:[#allocation5] sm:$0xff] }
 0x21c   :  { %v472_v12 = vsel %vm376_vm6, %v440_v2, %v456_v3  ;;  %vm287_vm11 = vmand %vm255_vm1, %vm271_vm2  ;;  %vm338_vm14 = vcmp.lt.f32.partialorder %v238_v56, 0.01995585  ;;  %v437_v16 = vsub.f32 2.0, %v1227_v59  ;;  %v404_v17 = vadd.f32 0.013333334, %v388_v60 }
 0x21d   :  { %498 = vmatprep.subr.mxu1 %v472_v12  ;;  %vm355_vm13 = vmand %vm323_vm4, %vm339_vm5  ;;  %v455_v14 = vsel %vm287_vm11, %v1205_v37, 0.0  ;;  %v209_v18 = vmul.f32 0.013333334, %v201_v63  ;;  %v1255_v20 = vmul.f32 75.0, %v403_v5  ;;  %v386_v21 = vsub.f32 %v1208_v40, %v1185_v11 }
 0x21e   :  { %v471_v19 = vsel %vm355_vm13, %v439_v53, %v455_v14  ;;  %vm286_vm15 = vmand %vm254_vm7, %vm270_vm8  ;;  %vm253_vm1 = vcmp.gt.f32.partialorder %v237_v4, -0.0066225166  ;;  %vm269_vm2 = vcmp.lt.f32.partialorder %v237_v4, 0.0066225166  ;;  %v438_v25 = vsub.f32 2.0, %v422_v6 }
 0x21f   :  { %499 = vmatpush1.msra.mxu1 %v471_v19  ;;  %vm1261_vm0 = vmand %vm286_vm15, %vm222_vm9  ;;  %vm321_vm4 = vcmp.gt.f32.partialorder %v237_v4, 0.0067108166  ;;  %vm337_vm5 = vcmp.lt.f32.partialorder %v237_v4, 0.01995585  ;;  %v235_v27 = vsub.f32 %v210_v62, %v1195_v24  ;;  %v200_v28 = vfloor.f32 %v192_v9 }
 0x220   :  { %vm354_vm3 = vmand %vm322_vm12, %vm338_vm14  ;;  %v454_v26 = vsel %vm1261_vm0, %v422_v6, 0.0  ;;  %vm252_vm7 = vcmp.gt.f32.partialorder %v236_v13, -0.0066225166  ;;  %vm268_vm8 = vcmp.lt.f32.partialorder %v236_v13, 0.0066225166  ;;  %v420_v29 = vmul.f32 75.0, %v404_v17 }
 0x221   :  { %vm374_vm6 = vmand %vm354_vm3, %vm1364_vm10  ;;  %v234_v30 = vsub.f32 %v209_v18, %v1189_v15  ;;  %v401_v31 = vadd.f32 0.013333334, %v385_v7  ;;  %v191_v33 = vmul.f32 75.0, %v1265_v23  ;;  %vm320_vm12 = vcmp.gt.f32.partialorder %v236_v13, 0.0067108166 }
 0x222   :  { %v470_v32 = vsel %vm374_vm6, %v438_v25, %v454_v26  ;;  %vm285_vm11 = vmand %vm253_vm1, %vm269_vm2  ;;  %vm336_vm14 = vcmp.lt.f32.partialorder %v236_v13, 0.01995585  ;;  %v435_v35 = vsub.f32 2.0, %v1255_v20  ;;  %v402_v36 = vadd.f32 0.013333334, %v386_v21 }
 0x223   :  { %500 = vmatprep.subr.mxu1 %v470_v32  ;;  %vm353_vm13 = vmand %vm321_vm4, %vm337_vm5  ;;  %v453_v34 = vsel %vm285_vm11, %v1227_v59, 0.0  ;;  %v383_v37 = vsub.f32 %v1232_v0, %v1183_v8  ;;  %v208_v39 = vmul.f32 0.013333334, %v200_v28  ;;  %v384_v40 = vsub.f32 %v1232_v0, %v1185_v11 }
 0x224   :  { %v469_v38 = vsel %vm353_vm13, %v437_v16, %v453_v34  ;;  %vm284_vm15 = vmand %vm252_vm7, %vm268_vm8  ;;  %vm251_vm1 = vcmp.gt.f32.partialorder %v235_v27, -0.0066225166  ;;  %vm267_vm2 = vcmp.lt.f32.partialorder %v235_v27, 0.0066225166  ;;  %v436_v43 = vsub.f32 2.0, %v420_v29 }
 0x225   :  { %501 = vmatpush1.msra.mxu1 %v469_v38  ;;  %vm1288_vm0 = vmand %vm284_vm15, %vm222_vm9  ;;  %vm319_vm4 = vcmp.gt.f32.partialorder %v235_v27, 0.0067108166  ;;  %vm335_vm5 = vcmp.lt.f32.partialorder %v235_v27, 0.01995585  ;;  %v233_v45 = vsub.f32 %v209_v18, %v1195_v24  ;;  %v199_v47 = vfloor.f32 %v191_v33 }
 0x226   :  { %vm352_vm3 = vmand %vm320_vm12, %vm336_vm14  ;;  %v452_v44 = vsel %vm1288_vm0, %v420_v29, 0.0  ;;  %vm250_vm7 = vcmp.gt.f32.partialorder %v234_v30, -0.0066225166  ;;  %vm266_vm8 = vcmp.lt.f32.partialorder %v234_v30, 0.0066225166  ;;  %v417_v48 = vmul.f32 75.0, %v401_v31 }
 0x227   :  { %vm372_vm6 = vmand %vm352_vm3, %vm1364_vm10  ;;  %v418_v49 = vmul.f32 75.0, %v402_v36  ;;  %v190_v50 = vmul.f32 75.0, %v1284_v41  ;;  %v232_v53 = vsub.f32 %v208_v39, %v1189_v15  ;;  %vm318_vm12 = vcmp.gt.f32.partialorder %v234_v30, 0.0067108166 }
 0x228   :  { %v468_v51 = vsel %vm372_vm6, %v436_v43, %v452_v44  ;;  %vm283_vm11 = vmand %vm251_vm1, %vm267_vm2  ;;  %vm334_vm14 = vcmp.lt.f32.partialorder %v234_v30, 0.01995585  ;;  %v399_v55 = vadd.f32 0.013333334, %v383_v37  ;;  %v400_v56 = vadd.f32 0.013333334, %v384_v40 }
 0x229   :  { %502 = vmatprep.subr.mxu1 %v468_v51  ;;  %vm351_vm13 = vmand %vm319_vm4, %vm335_vm5  ;;  %v451_v54 = vsel %vm283_vm11, %v1255_v20, 0.0  ;;  %v381_v57 = vsub.f32 %v1265_v23, %v1183_v8  ;;  %v207_v59 = vmul.f32 0.013333334, %v199_v47  ;;  %v382_v60 = vsub.f32 %v1265_v23, %v1185_v11 }
 0x22a   :  { %v467_v58 = vsel %vm351_vm13, %v435_v35, %v451_v54  ;;  %vm282_vm15 = vmand %vm250_vm7, %vm266_vm8  ;;  %vm249_vm1 = vcmp.gt.f32.partialorder %v233_v45, -0.0066225166  ;;  %vm265_vm2 = vcmp.lt.f32.partialorder %v233_v45, 0.0066225166  ;;  %v434_v62 = vsub.f32 2.0, %v418_v49 }
 0x22b   :  { %503 = vmatpush1.msra.mxu1 %v467_v58  ;;  %vm1310_vm0 = vmand %vm282_vm15, %vm222_vm9  ;;  %vm317_vm4 = vcmp.gt.f32.partialorder %v233_v45, 0.0067108166  ;;  %vm333_vm5 = vcmp.lt.f32.partialorder %v233_v45, 0.01995585  ;;  %v231_v0 = vsub.f32 %v208_v39, %v1195_v24  ;;  %v198_v1 = vfloor.f32 %v190_v50 }
 0x22c   :  { %vm350_vm3 = vmand %vm318_vm12, %vm334_vm14  ;;  %v450_v63 = vsel %vm1310_vm0, %v418_v49, 0.0  ;;  %vm248_vm7 = vcmp.gt.f32.partialorder %v232_v53, -0.0066225166  ;;  %vm264_vm8 = vcmp.lt.f32.partialorder %v232_v53, 0.0066225166  ;;  %v433_v2 = vsub.f32 2.0, %v417_v48 }
 0x22d   :  { %vm370_vm6 = vmand %vm350_vm3, %vm1364_vm10  ;;  %v416_v3 = vmul.f32 75.0, %v400_v56  ;;  %v230_v5 = vsub.f32 %v207_v59, %v1189_v15  ;;  %vm316_vm12 = vcmp.gt.f32.partialorder %v232_v53, 0.0067108166  ;;  %vm332_vm14 = vcmp.lt.f32.partialorder %v232_v53, 0.01995585 }
 0x22e   :  { %v466_v4 = vsel %vm370_vm6, %v434_v62, %v450_v63  ;;  %vm281_vm11 = vmand %vm249_vm1, %vm265_vm2  ;;  %v415_v7 = vmul.f32 75.0, %v399_v55  ;;  %v397_v9 = vadd.f32 0.013333334, %v381_v57  ;;  %v398_v12 = vadd.f32 0.013333334, %v382_v60 }
 0x22f   :  { %504 = vmatprep.subr.mxu1 %v466_v4  ;;  %vm349_vm13 = vmand %vm317_vm4, %vm333_vm5  ;;  %v449_v6 = vsel %vm281_vm11, %v417_v48, 0.0  ;;  %v206_v14 = vmul.f32 0.013333334, %v198_v1  ;;  %v380_v16 = vsub.f32 %v1284_v41, %v1185_v11  ;;  %vm247_vm1 = vcmp.gt.f32.partialorder %v231_v0, -0.0066225166 }
 0x230   :  { %v465_v13 = vsel %vm349_vm13, %v433_v2, %v449_v6  ;;  %vm280_vm15 = vmand %vm248_vm7, %vm264_vm8  ;;  %vm263_vm2 = vcmp.lt.f32.partialorder %v231_v0, 0.0066225166  ;;  %v432_v18 = vsub.f32 2.0, %v416_v3  ;;  %vm315_vm4 = vcmp.gt.f32.partialorder %v231_v0, 0.0067108166 }
 0x231   :  { %505 = vmatpush1.msra.mxu1 %v465_v13  ;;  %vm1327_vm0 = vmand %vm280_vm15, %vm222_vm9  ;;  %vm331_vm5 = vcmp.lt.f32.partialorder %v231_v0, 0.01995585  ;;  %v229_v20 = vsub.f32 %v207_v59, %v1195_v24  ;;  %v379_v11 = vsub.f32 %v1284_v41, %v1183_v8  ;;  %vm246_vm7 = vcmp.gt.f32.partialorder %v230_v5, -0.0066225166 }
 0x232   :  { %vm348_vm3 = vmand %vm316_vm12, %vm332_vm14  ;;  %v448_v19 = vsel %vm1327_vm0, %v416_v3, 0.0  ;;  %vm262_vm8 = vcmp.lt.f32.partialorder %v230_v5, 0.0066225166  ;;  %v431_v21 = vsub.f32 2.0, %v415_v7  ;;  %v414_v22 = vmul.f32 75.0, %v398_v12 }
 0x233   :  { %vm368_vm6 = vmand %vm348_vm3, %vm1364_vm10  ;;  %v228_v25 = vsub.f32 %v206_v14, %v1189_v15  ;;  %vm314_vm12 = vcmp.gt.f32.partialorder %v230_v5, 0.0067108166  ;;  %vm330_vm14 = vcmp.lt.f32.partialorder %v230_v5, 0.01995585  ;;  %v413_v27 = vmul.f32 75.0, %v397_v9 }
 0x234   :  { %v464_v23 = vsel %vm368_vm6, %v432_v18, %v448_v19  ;;  %vm279_vm11 = vmand %vm247_vm1, %vm263_vm2  ;;  %v396_v28 = vadd.f32 0.013333334, %v380_v16  ;;  %v395_v29 = vadd.f32 0.013333334, %v379_v11  ;;  %vm245_vm3 = vcmp.gt.f32.partialorder %v229_v20, -0.0066225166 }
 0x235   :  { %506 = vmatprep.subr.mxu1 %v464_v23  ;;  %vm347_vm13 = vmand %vm315_vm4, %vm331_vm5  ;;  %v447_v26 = vsel %vm279_vm11, %v415_v7, 0.0  ;;  %vm261_vm6 = vcmp.lt.f32.partialorder %v229_v20, 0.0066225166  ;;  %v430_v30 = vsub.f32 2.0, %v414_v22  ;;  %vm313_vm2 = vcmp.gt.f32.partialorder %v229_v20, 0.0067108166 }
 0x236   :  { %v463_v8 = vsel %vm347_vm13, %v431_v21, %v447_v26  ;;  %vm278_vm15 = vmand %vm246_vm7, %vm262_vm8  ;;  %vm329_vm4 = vcmp.lt.f32.partialorder %v229_v20, 0.01995585  ;;  %v227_v31 = vsub.f32 %v206_v14, %v1195_v24  ;;  %vm244_vm11 = vcmp.gt.f32.partialorder %v228_v25, -0.0066225166 }
 0x237   :  { %507 = vmatpush1.msra.mxu1 %v463_v8  ;;  %vm298_vm0 = vmand %vm278_vm15, %vm222_vm9  ;;  %vm260_vm13 = vcmp.lt.f32.partialorder %v228_v25, 0.0066225166  ;;  %v429_v32 = vsub.f32 2.0, %v413_v27  ;;  %v412_v33 = vmul.f32 75.0, %v396_v28  ;;  %vm312_vm15 = vcmp.gt.f32.partialorder %v228_v25, 0.0067108166 }
 0x238   :  { %vm346_vm1 = vmand %vm314_vm12, %vm330_vm14  ;;  %v446_v15 = vsel %vm298_vm0, %v414_v22, 0.0  ;;  %vm328_vm12 = vcmp.lt.f32.partialorder %v228_v25, 0.01995585  ;;  %v411_v36 = vmul.f32 75.0, %v395_v29  ;;  %v574_v44 = vadd.s32 136, %v992_v10 }
 0x239   :  { %vm366_vm5 = vmand %vm346_vm1, %vm1364_vm10  ;;  %vm243_vm1 = vcmp.gt.f32.partialorder %v227_v31, -0.0066225166  ;;  %vm259_vm10 = vcmp.lt.f32.partialorder %v227_v31, 0.0066225166  ;;  %v428_v24 = vsub.f32 2.0, %v412_v33  ;;  %v573_v45 = vadd.s32 128, %v992_v10 }
 0x23a   :  { %v462_v34 = vsel %vm366_vm5, %v430_v30, %v446_v15  ;;  %vm277_vm7 = vmand %vm245_vm3, %vm261_vm6  ;;  %vm311_vm3 = vcmp.gt.f32.partialorder %v227_v31, 0.0067108166  ;;  %vm327_vm6 = vcmp.lt.f32.partialorder %v227_v31, 0.01995585  ;;  %v427_v39 = vsub.f32 2.0, %v411_v36 }
 0x23b   :  { %508 = vmatprep.subr.mxu1 %v462_v34  ;;  %vm345_vm8 = vmand %vm313_vm2, %vm329_vm4  ;;  %v445_v35 = vsel %vm277_vm7, %v413_v27, 0.0  ;;  %vm1383_vm2 = vcmp.lt.s32.totalorder %v1117_v52, 150 }
 0x23c   :  { %v461_v37 = vsel %vm345_vm8, %v429_v32, %v445_v35  ;;  %vm276_vm14 = vmand %vm244_vm11, %vm260_vm13  ;;  %vm476_vm11 = vcmask 523264   ;;  %vm551_vm13 = vcmask 516096  }
 0x23d   :  { %509 = vmatpush1.msra.mxu1 %v461_v37  ;;  %vm296_vm0 = vmand %vm276_vm14, %vm222_vm9  ;;  %vm624_vm9 = vcmp.ge.s32.totalorder %v574_v44, %v1117_v52  ;;  %v552_v49 = vsel %vm551_vm13, %v475_v42, 0.0  ;;  %vm815_vm14 = vcmask 0  }
 0x23e   :  { %vm344_vm5 = vmand %vm312_vm15, %vm328_vm12  ;;  %v444_v38 = vsel %vm296_vm0, %v412_v33, 0.0  ;;  %870 = vmatprep.subr.msk.mxu0 %vm624_vm9, %v963_v46  ;;  %553 = vadd.xlane.f32.xlu0 %v552_v49  ;;  %vm796_vm15 = vcmask 1040384   ;;  %vm555_vm12 = vcmask 517121  }
 0x23f   :  { %vm364_vm4 = vmand %vm344_vm5, %vm1383_vm2  ;;  %778 = vmatpush2.msra.mxu0 %v963_v46 }
 0x240   :  { %v460_v40 = vsel %vm364_vm4, %v428_v24, %v444_v38  ;;  %vm275_vm7 = vmand %vm243_vm1, %vm259_vm10  ;;  %vm622_vm10 = vcmp.ge.s32.totalorder %v573_v45, %v1117_v52 }
 0x241   :  { %510 = vmatprep.subr.mxu1 %v460_v40  ;;  %vm343_vm8 = vmand %vm311_vm3, %vm327_vm6  ;;  %v443_v41 = vsel %vm275_vm7, %v411_v36, 0.0  ;;  %871 = vmatprep.subr.msk.mxu0 %vm622_vm10, %v963_v46 }
 0x242   :  { %v459_v43 = vsel %vm343_vm8, %v427_v39, %v443_v41  ;;  %780 = vmatpush2.msra.mxu0 %v963_v46  ;;  %v556_v46 = vsel %vm555_vm12, %v475_v42, 0.0 }
 0x243   :  { %511 = vmatpush1.msra.mxu1 %v459_v43 }
 0x244   :  { %839 = vmatmul.mubr.msk.f32.vlgmr.msra.gmra.mxu1 %vm476_vm11, %v475_v42 }
 0x2c7   :  { %v554_v2 = vpop.xlane.xlu0 %553 }
 0x2c8   :  { %v559_v4 = vmax.f32 %v554_v2, 1.0 }
 0x304   :  { %v546_v47 = vpop.f32.mrf.mxu1 }
 0x306   :  { %v548_v48 = vpop.f32.mrf.mxu1 }
 0x307   :  { %781 = vmatprep.mubr.f32.mxu0 %v548_v48 }
 0x308   :  { %782 = vmatmul.mubr.f32.vlgmr.msra.gmra.mxu0 %v546_v47 }
 0x3c8   :  { %v783_v50 = vpop.f32.mrf.mxu0 }
 0x3c9   :  { %v790_v51 = vrot.slane %v783_v50, 1 }
 0x3ca   :  { %v785_v10 = vpop.f32.mrf.mxu0 }
 0x3cb   :  { %v794_v53 = vmul.f32 %v790_v51, %v546_v47  ;;  %v791_v54 = vrot.slane %v785_v10, 1 }
 0x3cd   :  { %v795_v55 = vmul.f32 %v791_v54, %v548_v48  ;;  %v797_v56 = vsel %vm796_vm15, %v794_v53, 0.0 }
 0x3cf   :  { %v798_v52 = vsel %vm796_vm15, %v795_v55, 0.0 }
 0x3d0   :  { %v799_v57 = vadd.f32 %v798_v52, %v797_v56 }
 0x3d2   :  { %800 = vadd.xlane.f32.xlu1 %v799_v57 }
 0x3d6   :  { %557 = vadd.xlane.f32.xlu1 %v556_v46 }
 0x45b   :  { %v801_v58 = vpop.xlane.xlu1 %800 }
 0x45c   :  { %v802_v59 = vrot.slane %v801_v58, 4 }
 0x45e   :  { %v803_v60 = vadd.f32 %v802_v59, %v801_v58 }
 0x45f   :  { %v558_v1 = vpop.xlane.xlu1 %557 }
 0x460   :  { %v804_v61 = vrot.slane %v803_v60, 2  ;;  %v562_v3 = vmax.f32 %v558_v1, 1.0 }
 0x462   :  { %v805_v62 = vadd.f32 %v804_v61, %v803_v60  ;;  %889 = vrcp.f32 %v562_v3 }
 0x463   :  { %891 = vrcp.f32 %v559_v4 }
 0x464   :  { %v806_v63 = vrot.slane %v805_v62, 1 }
 0x466   :  { %v807_v0 = vadd.f32 %v806_v63, %v805_v62 }
 0x468   :  { %879 = vpush %v807_v0 }
 0x46f   :  { %v890_v5 = vpop.eup %889 }
 0x470   :  { %v892_v6 = vpop.eup %891  ;;  %v812_v7 = vrot.slane %v890_v5, 1 }
 0x499   :  { %s880_s0 = spop %879 }
 0x49a   :  { %v809_v9 = vstv %s880_s0 }
 0x49b   :  { %v810_v12 = vmul.f32 %v892_v6, %v809_v9 }
 0x49d   :  { %v814_v13 = vmul.f32 %v812_v7, %v810_v12 }
 0x49f   :  { %816 = vst.msk [vmem:[#allocation7] sm:$0x1] %vm815_vm14, %v814_v13 }
 0x4a0   :  { %944 = shalt.err (!%p941_p0)
}
 0x4a1   :  { %826 = dma.vmem_to_hbm [thread:$0]  %s824_s19, 16, %s1363_s2, [#allocation4]  }
 0x4a2   :  { %957 = dma.done.wait [#allocation4], 16  }
 0x4a3   :  { %958 = vsyncadd [#allocation4], 4294967280 }
 0x4a4   :  { %830 = vsyncpa [#allocation3], 1 }
 0x4a5   :  { %831 = vsyncpa [#allocation6], 1 }
 0x4a6   :  { %832 = vsyncpa [#allocation4], 1 }

</bundles_post_ra>
